<compile_context>
chip_gen: v5e
topology: v5e:2x2
jax: 0.10.0
libtpu: 0.0.40
codegen_flags: <defaults>
</compile_context>

<pallas_src>
import jax
import jax.numpy as jnp
from jax.experimental import pallas as pl
from jax.experimental.pallas import tpu as pltpu


def _round_up(x, m):
    return ((x + m - 1) // m) * m


def _dqn_kernel(x_ref, w1_ref, b1_ref, w2_ref, b2_ref, o_ref):
    # hidden = relu(x @ W1 + b1), accumulated in f32 on the MXU.
    h = jnp.dot(x_ref[...], w1_ref[...], preferred_element_type=jnp.float32)
    h = jnp.maximum(h + b1_ref[...].astype(jnp.float32), 0.0)
    # out = hidden @ W2 + b2. Cast hidden to the weight dtype for the MXU
    # (deliberate mixed-precision downcast if weights are bf16).
    o = jnp.dot(h.astype(w2_ref.dtype), w2_ref[...],
                preferred_element_type=jnp.float32)
    o = o + b2_ref[...].astype(jnp.float32)
    o_ref[...] = o.astype(o_ref.dtype)


def dqn_forward(x, w1, b1, w2, b2, *, tile_b=256):
    """Fused MLP forward.

    x: (B, D_in); w1: (D_in, H); b1: (1, H); w2: (H, O); b2: (1, O).
    Returns (B, O). Feature dims are lane-padded to 128 internally; the batch
    is tiled by `tile_b` (clamped / rounded for small batches).
    """
    B, D = x.shape
    H = w1.shape[1]
    O = w2.shape[1]
    LANE = 128
    SUBLANE = 8

    Dp = _round_up(D, LANE)
    Hp = _round_up(H, LANE)
    Op = _round_up(O, LANE)

    # Batch tile: big enough to fill the MXU M dimension and amortize per-step
    # overhead; for tiny batches just round up to the sublane multiple.
    TB = tile_b if B >= tile_b else _round_up(B, SUBLANE)
    Bp = _round_up(B, TB)

    # Zero-pad (mathematically inert: zero cols/rows, relu(0)=0).
    xp = jnp.pad(x, ((0, Bp - B), (0, Dp - D)))
    w1p = jnp.pad(w1, ((0, Dp - D), (0, Hp - H)))
    b1p = jnp.pad(b1, ((0, 0), (0, Hp - H)))
    w2p = jnp.pad(w2, ((0, Hp - H), (0, Op - O)))
    b2p = jnp.pad(b2, ((0, 0), (0, Op - O)))

    itemsize = jnp.dtype(x.dtype).itemsize
    cost = pl.CostEstimate(
        flops=2 * Bp * (Dp * Hp + Hp * Op),
        transcendentals=0,
        bytes_accessed=(xp.size + w1p.size + b1p.size + w2p.size + b2p.size
                        + Bp * Op) * itemsize,
    )

    out_p = pl.pallas_call(
        _dqn_kernel,
        out_shape=jax.ShapeDtypeStruct((Bp, Op), x.dtype),
        grid_spec=pltpu.PrefetchScalarGridSpec(
            num_scalar_prefetch=0,
            grid=(Bp // TB,),
            in_specs=[
                # x tile marches over the batch axis.
                pl.BlockSpec((TB, Dp), lambda i: (i, 0)),
                # Weights/biases: constant index_map -> resident in VMEM.
                pl.BlockSpec((Dp, Hp), lambda i: (0, 0)),
                pl.BlockSpec((1, Hp), lambda i: (0, 0)),
                pl.BlockSpec((Hp, Op), lambda i: (0, 0)),
                pl.BlockSpec((1, Op), lambda i: (0, 0)),
            ],
            out_specs=pl.BlockSpec((TB, Op), lambda i: (i, 0)),
        ),
        compiler_params=pltpu.CompilerParams(
            dimension_semantics=("parallel",)),
        cost_estimate=cost,
    )(xp, w1p, b1p, w2p, b2p)

    return out_p[:B, :O]


def init_dqn_params(key, input_size, hidden_size, output_size,
                    dtype=jnp.float32):
    """Deterministic init mimicking torch.nn.Linear (uniform +/- 1/sqrt(fan_in)).
    Weights are returned already transposed to (in, out)."""
    k1, k2, k3, k4 = jax.random.split(key, 4)
    lim1 = 1.0 / jnp.sqrt(jnp.asarray(input_size, dtype))
    lim2 = 1.0 / jnp.sqrt(jnp.asarray(hidden_size, dtype))
    w1 = jax.random.uniform(k1, (input_size, hidden_size), dtype, -lim1, lim1)
    b1 = jax.random.uniform(k2, (1, hidden_size), dtype, -lim1, lim1)
    w2 = jax.random.uniform(k3, (hidden_size, output_size), dtype, -lim2, lim2)
    b2 = jax.random.uniform(k4, (1, output_size), dtype, -lim2, lim2)
    return w1, b1, w2, b2


if __name__ == "__main__":
    input_size, hidden_size, output_size = 16, 32, 4

    key = jax.random.PRNGKey(0)
    kx, kp, kx2 = jax.random.split(key, 3)
    w1, b1, w2, b2 = init_dqn_params(kp, input_size, hidden_size, output_size)

    def ref_fwd(x):
        return jnp.maximum(x @ w1 + b1, 0.0) @ w2 + b2

    # Case 1: tiny batch (single tile, padded shapes).
    x_small = jax.random.normal(kx, (8, input_size), jnp.float32)
    out_small = dqn_forward(x_small, w1, b1, w2, b2)
    jax.block_until_ready(out_small)
    assert out_small.shape == (8, output_size)
    assert jnp.allclose(out_small, ref_fwd(x_small), atol=1e-5, rtol=1e-5)

    # Case 2: batch not a multiple of the tile -> exercises batch tiling,
    # pipelining, and batch padding (300 -> 2 tiles of 256).
    x_big = jax.random.normal(kx2, (300, input_size), jnp.float32)
    out_big = dqn_forward(x_big, w1, b1, w2, b2, tile_b=256)
    jax.block_until_ready(out_big)
    assert out_big.shape == (300, output_size)
    assert jnp.allclose(out_big, ref_fwd(x_big), atol=1e-5, rtol=1e-5)

    print("KERNEL_OK")
</pallas_src>

<mosaic_0001>
module attributes {stable_mosaic.version = 11 : i64} {
  func.func @_dqn_kernel(%arg0: i32, %arg1: memref<8x128xf32, #tpu.memory_space<vmem>>, %arg2: memref<128x128xf32, #tpu.memory_space<vmem>>, %arg3: memref<1x128xf32, #tpu.memory_space<vmem>>, %arg4: memref<128x128xf32, #tpu.memory_space<vmem>>, %arg5: memref<1x128xf32, #tpu.memory_space<vmem>>, %arg6: memref<8x128xf32, #tpu.memory_space<vmem>>) attributes {dimension_semantics = [#tpu.dimension_semantics<parallel>], iteration_bounds = array<i64: 1>, scalar_prefetch = 0 : i64, scratch_operands = 0 : i64, tpu.core_type = #tpu.core_type<tc>, window_params = [{transform_indices = @transform_0, window_bounds = array<i64: 8, 128>}, {pipeline_mode = #tpu.pipeline_mode<synchronous>, transform_indices = @transform_1, window_bounds = array<i64: 128, 128>}, {pipeline_mode = #tpu.pipeline_mode<synchronous>, transform_indices = @transform_2, window_bounds = array<i64: 1, 128>}, {pipeline_mode = #tpu.pipeline_mode<synchronous>, transform_indices = @transform_3, window_bounds = array<i64: 128, 128>}, {pipeline_mode = #tpu.pipeline_mode<synchronous>, transform_indices = @transform_4, window_bounds = array<i64: 1, 128>}, {transform_indices = @transform_5, window_bounds = array<i64: 8, 128>}]} {
    %c0 = arith.constant 0 : index
    %c0_0 = arith.constant 0 : index
    %0 = vector.load %arg1[%c0, %c0_0] : memref<8x128xf32, #tpu.memory_space<vmem>>, vector<8x128xf32>
    %c0_1 = arith.constant 0 : index
    %c0_2 = arith.constant 0 : index
    %1 = vector.load %arg2[%c0_1, %c0_2] : memref<128x128xf32, #tpu.memory_space<vmem>>, vector<128x128xf32>
    %cst = arith.constant dense<0.000000e+00> : vector<8x128xf32>
    %2 = tpu.matmul %0, %1, %cst {dimension_numbers = #tpu.dot_dimension_numbers<[1], [0], [0], [1], [0, 0, 1, 1], [], []>} : vector<8x128xf32>, vector<128x128xf32>, vector<8x128xf32> -> vector<8x128xf32>
    %c0_3 = arith.constant 0 : index
    %c0_4 = arith.constant 0 : index
    %3 = vector.load %arg3[%c0_3, %c0_4] : memref<1x128xf32, #tpu.memory_space<vmem>>, vector<1x128xf32>
    %4 = vector.broadcast %3 : vector<1x128xf32> to vector<8x128xf32>
    %5 = arith.addf %2, %4 : vector<8x128xf32>
    %cst_5 = arith.constant 0.000000e+00 : f32
    %6 = vector.broadcast %cst_5 : f32 to vector<8x128xf32>
    %7 = arith.maximumf %5, %6 : vector<8x128xf32>
    %c0_6 = arith.constant 0 : index
    %c0_7 = arith.constant 0 : index
    %8 = vector.load %arg4[%c0_6, %c0_7] : memref<128x128xf32, #tpu.memory_space<vmem>>, vector<128x128xf32>
    %cst_8 = arith.constant dense<0.000000e+00> : vector<8x128xf32>
    %9 = tpu.matmul %7, %8, %cst_8 {dimension_numbers = #tpu.dot_dimension_numbers<[1], [0], [0], [1], [0, 0, 1, 1], [], []>} : vector<8x128xf32>, vector<128x128xf32>, vector<8x128xf32> -> vector<8x128xf32>
    %c0_9 = arith.constant 0 : index
    %c0_10 = arith.constant 0 : index
    %10 = vector.load %arg5[%c0_9, %c0_10] : memref<1x128xf32, #tpu.memory_space<vmem>>, vector<1x128xf32>
    %11 = vector.broadcast %10 : vector<1x128xf32> to vector<8x128xf32>
    %12 = arith.addf %9, %11 : vector<8x128xf32>
    %c0_11 = arith.constant 0 : index
    %c0_12 = arith.constant 0 : index
    %13 = vector.load %arg6[%c0_11, %c0_12] : memref<8x128xf32, #tpu.memory_space<vmem>>, vector<8x128xf32>
    tpu.vector_store %arg6[%c0_11, %c0_12], %12 {strides = array<i32>} : memref<8x128xf32, #tpu.memory_space<vmem>>, vector<8x128xf32>,
    return
  }
  func.func @transform_0(%arg0: i32) -> (i32, i32) {
    %c0_i32 = arith.constant 0 : i32
    %c0_i32_0 = arith.constant 0 : i32
    return %arg0, %c0_i32 : i32, i32
  }
  func.func @transform_1(%arg0: i32) -> (i32, i32) {
    %c0_i32 = arith.constant 0 : i32
    %c0_i32_0 = arith.constant 0 : i32
    %c0_i32_1 = arith.constant 0 : i32
    return %c0_i32, %c0_i32_0 : i32, i32
  }
  func.func @transform_2(%arg0: i32) -> (i32, i32) {
    %c0_i32 = arith.constant 0 : i32
    %c0_i32_0 = arith.constant 0 : i32
    %c0_i32_1 = arith.constant 0 : i32
    return %c0_i32, %c0_i32_0 : i32, i32
  }
  func.func @transform_3(%arg0: i32) -> (i32, i32) {
    %c0_i32 = arith.constant 0 : i32
    %c0_i32_0 = arith.constant 0 : i32
    %c0_i32_1 = arith.constant 0 : i32
    return %c0_i32, %c0_i32_0 : i32, i32
  }
  func.func @transform_4(%arg0: i32) -> (i32, i32) {
    %c0_i32 = arith.constant 0 : i32
    %c0_i32_0 = arith.constant 0 : i32
    %c0_i32_1 = arith.constant 0 : i32
    return %c0_i32, %c0_i32_0 : i32, i32
  }
  func.func @transform_5(%arg0: i32) -> (i32, i32) {
    %c0_i32 = arith.constant 0 : i32
    %c0_i32_0 = arith.constant 0 : i32
    return %arg0, %c0_i32 : i32, i32
  }
}

</mosaic_0001>

<bundles_post_ra>
// kernel: tpu_custom_call.1
= control target key start
LH: loop header
LB: loop body
LE: loop exit
PB: predicated region body
PF: predicated region fallthrough
CT: control target
= control target key end

     0   :  { %10 = vsyncpa [#allocation3], 0  ;;  %s331_s0 = inlined_call_operand.hbm [shape: f32[8,128], index: 0, kind: input, shape index: {}]   ;;  %s332_s1 = inlined_call_operand.hbm [shape: f32[128,128], index: 1, kind: input, shape index: {}]   ;;  %s333_s2 = inlined_call_operand.vmem [shape: f32[1,128], index: 2, kind: input, shape index: {}]   ;;  %s334_s3 = inlined_call_operand.hbm [shape: f32[128,128], index: 3, kind: input, shape index: {}]   ;;  %s335_s4 = inlined_call_operand.vmem [shape: f32[1,128], index: 4, kind: input, shape index: {}]   ;;  %s336_s5 = inlined_call_operand.hbm [shape: f32[8,128], index: 5, kind: output, shape index: {}]  }
   0x1   :  { %11 = vsyncpa [#allocation6], 0  ;;  %s28_s20 = sshll.u32 %s332_s1, 4  ;;  %s29_s20 = int_to_ptr.hbm [resolvable:$true] %s28_s20 }
   0x2   :  { %12 = vsyncpa [#allocation4], 0  ;;  %s277_s21 = smov [#allocation5]   ;;  %s18_s25 = sshll.u32 %s331_s0, 4  ;;  %s19_s25 = int_to_ptr.hbm [resolvable:$true] %s18_s25 }
   0x3   :  { %s30_s22 = sshll.u32 %s277_s21, 4  ;;  %s278_s26 = smov 128   ;;  %s31_s22 = int_to_ptr.vmem [resolvable:$true] %s30_s22 }
   0x4   :  { %s279_s27 = smov 8   ;;  %s280_s28 = smov [#allocation2]  }
   0x5   :  { %36 = dma.hbm_to_vmem [thread:$0]  %s29_s20, 2048, %s31_s22, [#allocation6], %s278_s26, %s278_s26, %s279_s27  }
   0x6   :  { %s20_s29 = sshll.u32 %s280_s28, 4  ;;  %s43_s7 = sshll.u32 %s334_s3, 4  ;;  %s21_s29 = int_to_ptr.vmem [resolvable:$true] %s20_s29  ;;  %s44_s7 = int_to_ptr.hbm [resolvable:$true] %s43_s7 }
   0x7   :  { %23 = dma.hbm_to_vmem [thread:$0]  %s19_s25, 128, %s21_s29, [#allocation3]  }
   0x8   :  { %s281_s1 = smov [#allocation7]  }
   0x9   :  { %s45_s8 = sshll.u32 %s281_s1, 4  ;;  %s46_s8 = int_to_ptr.vmem [resolvable:$true] %s45_s8 }
   0xa   :  { %51 = dma.hbm_to_vmem [thread:$0]  %s44_s7, 2048, %s46_s8, [#allocation6], %s278_s26, %s278_s26, %s279_s27  }
   0xb   :  { %271 = dma.done.wait [#allocation3], 128  }
   0xc   :  { %272 = vsyncadd [#allocation3], 4294967168 }
   0xd   :  { %273 = dma.done.wait [#allocation6], 4096  }
   0xe   :  { %274 = vsyncadd [#allocation6], 4294963200  ;;  %v82_v0 = vld [vmem:[#allocation5 + $0x78] sm:$0xff]  ;;  %v81_v1 = vld [vmem:[#allocation5 + $0x70] sm:$0xff]  ;;  %s282_s11 = smov [#allocation8]   ;;  %s156_s15 = sshll.u32 %s336_s5, 4  ;;  %s157_s15 = int_to_ptr.hbm [resolvable:$true] %s156_s15 }
   0xf   :  { %87 = vmatpush.msra.mxu0 %v82_v0  ;;  %v80_v2 = vld [vmem:[#allocation5 + $0x68] sm:$0xff]  ;;  %v79_v3 = vld [vmem:[#allocation5 + $0x60] sm:$0xff]  ;;  %v123_v4 = vld [vmem:[#allocation7 + $0x78] sm:$0xff]  ;;  %s154_s12 = sshll.u32 %s282_s11, 4  ;;  %s155_s12 = int_to_ptr.vmem [resolvable:$true] %s154_s12 }
  0x10   :  { %v78_v5 = vld [vmem:[#allocation5 + $0x58] sm:$0xff]  ;;  %128 = vmatpush.msra.mxu1 %v123_v4  ;;  %v122_v6 = vld [vmem:[#allocation7 + $0x70] sm:$0xff]  ;;  %v121_v7 = vld [vmem:[#allocation7 + $0x68] sm:$0xff] }
  0x11   :  { %88 = vmatpush.msra.mxu0 %v81_v1  ;;  %v77_v8 = vld [vmem:[#allocation5 + $0x50] sm:$0xff]  ;;  %v120_v9 = vld [vmem:[#allocation7 + $0x60] sm:$0xff]  ;;  %v76_v10 = vld [vmem:[#allocation5 + $0x48] sm:$0xff] }
  0x12   :  { %129 = vmatpush.msra.mxu1 %v122_v6  ;;  %v119_v11 = vld [vmem:[#allocation7 + $0x58] sm:$0xff]  ;;  %v75_v12 = vld [vmem:[#allocation5 + $0x40] sm:$0xff]  ;;  %v118_v13 = vld [vmem:[#allocation7 + $0x50] sm:$0xff] }
  0x13   :  { %89 = vmatpush.msra.mxu0 %v80_v2  ;;  %v74_v14 = vld [vmem:[#allocation5 + $0x38] sm:$0xff]  ;;  %v117_v15 = vld [vmem:[#allocation7 + $0x48] sm:$0xff]  ;;  %v73_v16 = vld [vmem:[#allocation5 + $0x30] sm:$0xff] }
  0x14   :  { %130 = vmatpush.msra.mxu1 %v121_v7  ;;  %v116_v17 = vld [vmem:[#allocation7 + $0x40] sm:$0xff]  ;;  %v72_v18 = vld [vmem:[#allocation5 + $0x28] sm:$0xff]  ;;  %v115_v19 = vld [vmem:[#allocation7 + $0x38] sm:$0xff] }
  0x15   :  { %90 = vmatpush.msra.mxu0 %v79_v3  ;;  %v71_v20 = vld [vmem:[#allocation5 + $0x20] sm:$0xff]  ;;  %v114_v21 = vld [vmem:[#allocation7 + $0x30] sm:$0xff]  ;;  %v70_v22 = vld [vmem:[#allocation5 + $0x18] sm:$0xff] }
  0x16   :  { %131 = vmatpush.msra.mxu1 %v120_v9  ;;  %v113_v23 = vld [vmem:[#allocation7 + $0x28] sm:$0xff]  ;;  %v69_v24 = vld [vmem:[#allocation5 + $0x10] sm:$0xff]  ;;  %v112_v25 = vld [vmem:[#allocation7 + $0x20] sm:$0xff] }
  0x17   :  { %91 = vmatpush.msra.mxu0 %v78_v5  ;;  %v68_v26 = vld [vmem:[#allocation5 + $0x8] sm:$0xff]  ;;  %v111_v27 = vld [vmem:[#allocation7 + $0x18] sm:$0xff]  ;;  %v67_v28 = vld [vmem:[#allocation5] sm:$0xff] }
  0x18   :  { %132 = vmatpush.msra.mxu1 %v119_v11  ;;  %v66_v29 = vld [vmem:[#allocation2] sm:$0xff]  ;;  %v110_v30 = vld [vmem:[#allocation7 + $0x10] sm:$0xff]  ;;  %v109_v31 = vld [vmem:[#allocation7 + $0x8] sm:$0xff] }
  0x19   :  { %92 = vmatpush.msra.mxu0 %v77_v8  ;;  %v108_v32 = vld [vmem:[#allocation7] sm:$0xff]  ;;  %v173_v33 = vld [vmem:[%s333_s2] ss:$0 sm:$0xff] }
  0x1a   :  { %133 = vmatpush.msra.mxu1 %v118_v13  ;;  %v174_v37 = vld [vmem:[%s335_s4] ss:$0 sm:$0xff] }
  0x1b   :  { %93 = vmatpush.msra.mxu0 %v76_v10 }
  0x1c   :  { %134 = vmatpush.msra.mxu1 %v117_v15 }
  0x1d   :  { %94 = vmatpush.msra.mxu0 %v75_v12 }
  0x1e   :  { %135 = vmatpush.msra.mxu1 %v116_v17 }
  0x1f   :  { %95 = vmatpush.msra.mxu0 %v74_v14 }
  0x20   :  { %136 = vmatpush.msra.mxu1 %v115_v19 }
  0x21   :  { %96 = vmatpush.msra.mxu0 %v73_v16 }
  0x22   :  { %137 = vmatpush.msra.mxu1 %v114_v21 }
  0x23   :  { %97 = vmatpush.msra.mxu0 %v72_v18 }
  0x24   :  { %138 = vmatpush.msra.mxu1 %v113_v23 }
  0x25   :  { %98 = vmatpush.msra.mxu0 %v71_v20 }
  0x26   :  { %139 = vmatpush.msra.mxu1 %v112_v25 }
  0x27   :  { %99 = vmatpush.msra.mxu0 %v70_v22 }
  0x28   :  { %140 = vmatpush.msra.mxu1 %v111_v27 }
  0x29   :  { %100 = vmatpush.msra.mxu0 %v69_v24 }
  0x2a   :  { %141 = vmatpush.msra.mxu1 %v110_v30 }
  0x2b   :  { %101 = vmatpush.msra.mxu0 %v68_v26 }
  0x2c   :  { %142 = vmatpush.msra.mxu1 %v109_v31 }
  0x2d   :  { %102 = vmatpush.msra.mxu0 %v67_v28 }
  0x2e   :  { %103 = vmatmul.f32.vlgmr.msra.gmra.mxu0 %v66_v29  ;;  %143 = vmatpush.msra.mxu1 %v108_v32 }
  0xab   :  { %v104_v34 = vpop.f32.mrf.mxu0 }
  0xac   :  { %v105_v35 = vadd.f32 %v173_v33, %v104_v34 }
  0xae   :  { %v107_v36 = vmax.f32 %v105_v35, 0.0 }
  0xb0   :  { %144 = vmatmul.f32.vlgmr.msra.gmra.mxu1 %v107_v36 }
 0x12d   :  { %v145_v38 = vpop.f32.mrf.mxu1 }
 0x12e   :  { %v146_v39 = vadd.f32 %v174_v37, %v145_v38 }
 0x130   :  { %148 = vst [vmem:[#allocation8] sm:$0xff] %v146_v39 }
 0x131   :  { %159 = dma.vmem_to_hbm [thread:$0]  %s155_s12, 128, %s157_s15, [#allocation4]  }
 0x132   :  { %275 = dma.done.wait [#allocation4], 128  }
 0x133   :  { %276 = vsyncadd [#allocation4], 4294967168 }
 0x134   :  { %164 = vsyncpa [#allocation3], 1 }
 0x135   :  { %165 = vsyncpa [#allocation6], 1 }
 0x136   :  { %166 = vsyncpa [#allocation4], 1 }

</bundles_post_ra>
